<compile_context>
chip_gen: v7x
topology: tpu7x:2x2x1
jax: 0.10.0
libtpu: 0.0.40
codegen_flags: <defaults>
</compile_context>

<pallas_src>
import functools
import math

import jax
import jax.numpy as jnp
from jax import lax
from jax.experimental import pallas as pl
from jax.experimental.pallas import tpu as pltpu

_NEG_INF = -1e9


# ----------------------------------------------------------------------------
# chip-gated defaults
# ----------------------------------------------------------------------------
def _chip_config():
    """Pick tile sizes / VMEM budget from the detected TPU generation."""
    vmem_phys = 64 * 1024 * 1024
    try:
        info = pltpu.get_tpu_info()
        for attr in ("vmem_capacity_bytes", "vmem_size_bytes", "vmem_bytes"):
            val = getattr(info, attr, None)
            if val:
                vmem_phys = int(val)
                break
    except Exception:
        pass  # stay conservative (v7x-sized) if the query is unavailable
    if vmem_phys >= 100 * 1024 * 1024:     # v5e / v6e: 128 MiB physical VMEM
        return {"vmem_limit": 96 * 1024 * 1024, "tm": 512, "tf": 1024}
    return {"vmem_limit": 48 * 1024 * 1024, "tm": 256, "tf": 512}   # v7x: 64 MiB


_CHIP_CFG = _chip_config()


# ----------------------------------------------------------------------------
# helpers
# ----------------------------------------------------------------------------
def _round_up(n: int, m: int) -> int:
    return ((n + m - 1) // m) * m


def _cdiv(a: int, b: int) -> int:
    return -(-a // b)


def _pad_rows(x2d, rows):
    pad = rows - x2d.shape[0]
    return x2d if pad == 0 else jnp.pad(x2d, ((0, pad), (0, 0)))


def _row_tiling(M, tm):
    """Pick a row tile <= tm that divides a tightly padded M (avoids big padding waste)."""
    m_min = _round_up(M, 8)
    n_m = max(1, _cdiv(m_min, tm))
    tm_eff = _round_up(_cdiv(m_min, n_m), 8)
    return tm_eff, tm_eff * n_m


def _pick_head_group(H):
    """Heads per attention grid step: all heads if H<=8, else a multiple of 8 (sublane rule)."""
    if H <= 8:
        return H
    for g in (8, 16):
        if H % g == 0:
            return g
    return H


# ----------------------------------------------------------------------------
# fused Norm1 + QKV projection kernel
# ----------------------------------------------------------------------------
def _norm_qkv_kernel(x_ref, a_ref, b_ref, w_ref, bias_ref, q_ref, k_ref, v_ref,
                     *, eps, n, d_model):
    x = x_ref[...].astype(jnp.float32)
    mean = jnp.mean(x, axis=-1, keepdims=True)
    var = jnp.sum((x - mean) ** 2, axis=-1, keepdims=True) * (1.0 / (n - 1))  # unbiased std
    h = a_ref[...] * (x - mean) / (jnp.sqrt(var) + eps) + b_ref[...]
    h = h.astype(w_ref.dtype)
    y = jnp.dot(h, w_ref[...], preferred_element_type=jnp.float32)
    y = y + bias_ref[...].astype(jnp.float32)
    q_ref[...] = y[:, :d_model].astype(q_ref.dtype)
    k_ref[...] = y[:, d_model:2 * d_model].astype(k_ref.dtype)
    v_ref[...] = y[:, 2 * d_model:].astype(v_ref.dtype)


def norm_qkv_projection(x2d, alpha, bias, wqkv, bqkv, *, eps, tm):
    M, D = x2d.shape
    three_d = wqkv.shape[1]
    tm_eff, Mp = _row_tiling(M, tm)
    xp = _pad_rows(x2d, Mp)
    a = jnp.asarray(alpha, jnp.float32).reshape(1, 1)
    b = jnp.asarray(bias, jnp.float32).reshape(1, 1)
    bq = bqkv.reshape(1, three_d)

    itemsize = jnp.dtype(x2d.dtype).itemsize
    cost = pl.CostEstimate(
        flops=int(2 * Mp * D * three_d + 6 * Mp * D),
        transcendentals=int(Mp),
        bytes_accessed=int((Mp * D + D * three_d + three_d + 3 * Mp * D) * itemsize))

    out_sds = jax.ShapeDtypeStruct((Mp, D), x2d.dtype)
    q, k, v = pl.pallas_call(
        functools.partial(_norm_qkv_kernel, eps=eps, n=D, d_model=D),
        out_shape=(out_sds, out_sds, out_sds),
        grid_spec=pltpu.PrefetchScalarGridSpec(
            num_scalar_prefetch=0,
            grid=(Mp // tm_eff,),
            in_specs=[
                pl.BlockSpec((tm_eff, D), lambda i: (i, 0)),
                pl.BlockSpec((1, 1), lambda i: (0, 0)),
                pl.BlockSpec((1, 1), lambda i: (0, 0)),
                pl.BlockSpec((D, three_d), lambda i: (0, 0)),
                pl.BlockSpec((1, three_d), lambda i: (0, 0)),
            ],
            out_specs=(pl.BlockSpec((tm_eff, D), lambda i: (i, 0)),) * 3,
        ),
        compiler_params=pltpu.CompilerParams(
            dimension_semantics=("parallel",),
            vmem_limit_bytes=_CHIP_CFG["vmem_limit"]),
        cost_estimate=cost,
    )(xp, a, b, wqkv, bq)
    return q[:M], k[:M], v[:M]


# ----------------------------------------------------------------------------
# head-grouped, kv-tiled online-softmax attention kernel
# grid = (B, H // hg, n_kv); output written as (B, S, D) -> lane-dense stores
# ----------------------------------------------------------------------------
def _mha_kernel(q_ref, k_ref, v_ref, mask_ref, o_ref, m_sc, l_sc, acc_sc,
                *, scale, heads_per_group, d_k):
    kv = pl.program_id(2)

    @pl.when(kv == 0)
    def _init():
        m_sc[...] = jnp.full_like(m_sc, -jnp.inf)
        l_sc[...] = jnp.zeros_like(l_sc)
        acc_sc[...] = jnp.zeros_like(acc_sc)

    q = q_ref[...]                                  # (S, hg, dk)
    k = k_ref[...]                                  # (tk, hg, dk)
    v = v_ref[...]                                  # (tk, hg, dk)
    s = lax.dot_general(q, k, (((2,), (2,)), ((1,), (1,))),
                        preferred_element_type=jnp.float32) * scale     # (hg, S, tk)
    msk = mask_ref[...][None]                       # (1, S, tk) int8
    s = jnp.where(msk == 0, _NEG_INF, s)            # masked_fill(mask == 0, -1e9)

    m_prev = m_sc[...]
    m_new = jnp.maximum(m_prev, jnp.max(s, axis=-1, keepdims=True))
    alpha = jnp.exp(m_prev - m_new)
    p = jnp.exp(s - m_new)
    l_sc[...] = alpha * l_sc[...] + jnp.sum(p, axis=-1, keepdims=True)
    pv = lax.dot_general(p.astype(v.dtype), v, (((2,), (0,)), ((0,), (1,))),
                         preferred_element_type=jnp.float32)            # (hg, S, dk)
    acc_sc[...] = alpha * acc_sc[...] + pv
    m_sc[...] = m_new
    # TODO(synk): attention dropout (nn.Dropout) is identity in eval mode.

    @pl.when(kv == pl.num_programs(2) - 1)
    def _finalize():
        o = acc_sc[...] / l_sc[...]                 # (hg, S, dk) f32
        for h in range(heads_per_group):            # static unroll; (S, hg*dk) HBM block
            o_ref[:, h * d_k:(h + 1) * d_k] = o[h].astype(o_ref.dtype)


def multi_head_attention(q, k, v, mask, *, scale, kv_tile=256):
    """q/k/v: (B, S, H, dk) (a free reshape of the (M, D) projections); mask: (..., S, S)."""
    assert kv_tile % 128 == 0
    B, S, H, dk = q.shape
    D = H * dk
    hg = _pick_head_group(H)
    n_hg = H // hg

    if S <= kv_tile:
        tk, Skv = S, S
    else:
        tk = kv_tile
        Skv = _round_up(S, tk)
    n_kv = Skv // tk

    # int8 mask (1 = keep, 0 = masked); kv padding gets 0 -> excluded from softmax.
    if mask is None:
        mask_i8 = jnp.ones((B, 1, S, S), jnp.int8)
    else:
        mask_i8 = (jnp.broadcast_to(mask, (B, 1, S, S)) != 0).astype(jnp.int8)
    if Skv > S:
        mask_i8 = jnp.pad(mask_i8, ((0, 0), (0, 0), (0, 0), (0, Skv - S)))
        k = jnp.pad(k, ((0, 0), (0, Skv - S), (0, 0), (0, 0)))
        v = jnp.pad(v, ((0, 0), (0, Skv - S), (0, 0), (0, 0)))

    itemsize = jnp.dtype(q.dtype).itemsize
    cost = pl.CostEstimate(
        flops=int(4 * B * H * S * Skv * dk),
        transcendentals=int(B * H * S * Skv),
        bytes_accessed=int((3 * B * Skv * D + B * S * D) * itemsize + B * S * Skv))

    q_spec = pl.BlockSpec((pl.Squeezed(), S, hg, dk), lambda b, g, kv: (b, 0, g, 0))
    kv_spec = pl.BlockSpec((pl.Squeezed(), tk, hg, dk), lambda b, g, kv: (b, kv, g, 0))
    m_spec = pl.BlockSpec((pl.Squeezed(), pl.Squeezed(), S, tk),
                          lambda b, g, kv: (b, 0, 0, kv))
    o_spec = pl.BlockSpec((pl.Squeezed(), S, hg * dk), lambda b, g, kv: (b, 0, g))

    return pl.pallas_call(
        functools.partial(_mha_kernel, scale=scale, heads_per_group=hg, d_k=dk),
        out_shape=jax.ShapeDtypeStruct((B, S, D), q.dtype),
        grid_spec=pltpu.PrefetchScalarGridSpec(
            num_scalar_prefetch=0,
            grid=(B, n_hg, n_kv),                    # reduction (kv) axis last
            in_specs=[q_spec, kv_spec, kv_spec, m_spec],
            out_specs=o_spec,
            scratch_shapes=[
                pltpu.VMEM((hg, S, 1), jnp.float32),     # running max
                pltpu.VMEM((hg, S, 1), jnp.float32),     # running denom
                pltpu.VMEM((hg, S, dk), jnp.float32),    # running numerator
            ],
        ),
        compiler_params=pltpu.CompilerParams(
            dimension_semantics=("parallel", "parallel", "arbitrary"),
            vmem_limit_bytes=_CHIP_CFG["vmem_limit"]),
        cost_estimate=cost,
    )(q, k, v, mask_i8)


# ----------------------------------------------------------------------------
# fused W_O projection + bias + residual kernel
# ----------------------------------------------------------------------------
def _linear_res_kernel(x_ref, w_ref, b_ref, r_ref, o_ref):
    y = jnp.dot(x_ref[...], w_ref[...], preferred_element_type=jnp.float32)
    y = y + b_ref[...].astype(jnp.float32) + r_ref[...].astype(jnp.float32)
    o_ref[...] = y.astype(o_ref.dtype)


def linear_residual(x2d, w, b, residual2d, *, tm):
    M, Din = x2d.shape
    Dout = w.shape[1]
    tm_eff, Mp = _row_tiling(M, tm)
    xp = _pad_rows(x2d, Mp)
    rp = _pad_rows(residual2d, Mp)
    b2 = b.reshape(1, Dout)

    itemsize = jnp.dtype(x2d.dtype).itemsize
    cost = pl.CostEstimate(
        flops=int(2 * Mp * Din * Dout),
        transcendentals=0,
        bytes_accessed=int((Mp * Din + Din * Dout + Dout + 2 * Mp * Dout) * itemsize))

    out = pl.pallas_call(
        _linear_res_kernel,
        out_shape=jax.ShapeDtypeStruct((Mp, Dout), x2d.dtype),
        grid_spec=pltpu.PrefetchScalarGridSpec(
            num_scalar_prefetch=0,
            grid=(Mp // tm_eff,),
            in_specs=[
                pl.BlockSpec((tm_eff, Din), lambda i: (i, 0)),
                pl.BlockSpec((Din, Dout), lambda i: (0, 0)),
                pl.BlockSpec((1, Dout), lambda i: (0, 0)),
                pl.BlockSpec((tm_eff, Dout), lambda i: (i, 0)),
            ],
            out_specs=pl.BlockSpec((tm_eff, Dout), lambda i: (i, 0)),
        ),
        compiler_params=pltpu.CompilerParams(
            dimension_semantics=("parallel",),
            vmem_limit_bytes=_CHIP_CFG["vmem_limit"]),
        cost_estimate=cost,
    )(xp, w, b2, rp)
    return out[:M]


# ----------------------------------------------------------------------------
# fused Norm2 + FFN (+ residual) kernel
# grid = (M tiles, d_ff chunks); normalized tile cached in VMEM scratch at j==0
# ----------------------------------------------------------------------------
def _norm_ffn_kernel(x_ref, a_ref, b_ref, w1_ref, b1_ref, w2_ref, b2_ref,
                     o_ref, h_ref, acc_ref, *, eps, n):
    j = pl.program_id(1)

    @pl.when(j == 0)
    def _init():
        x = x_ref[...].astype(jnp.float32)
        mean = jnp.mean(x, axis=-1, keepdims=True)
        var = jnp.sum((x - mean) ** 2, axis=-1, keepdims=True) * (1.0 / (n - 1))
        hn = a_ref[...] * (x - mean) / (jnp.sqrt(var) + eps) + b_ref[...]
        h_ref[...] = hn.astype(h_ref.dtype)
        acc_ref[...] = jnp.zeros_like(acc_ref)

    hc = jnp.dot(h_ref[...], w1_ref[...], preferred_element_type=jnp.float32)
    hc = jnp.maximum(hc + b1_ref[...].astype(jnp.float32), 0.0)
    # TODO(synk): FFN dropout (nn.Dropout) is identity in eval mode.
    acc_ref[...] += jnp.dot(hc.astype(w2_ref.dtype), w2_ref[...],
                            preferred_element_type=jnp.float32)

    @pl.when(j == pl.num_programs(1) - 1)
    def _finalize():
        y = acc_ref[...] + b2_ref[...].astype(jnp.float32) + x_ref[...].astype(jnp.float32)
        o_ref[...] = y.astype(o_ref.dtype)


def norm_ffn(x2d, alpha, bias, w1, b1, w2, b2, *, eps, tm, tf):
    M, D = x2d.shape
    d_ff = w1.shape[1]
    tm_eff, Mp = _row_tiling(M, tm)
    tf_eff = tf if d_ff > tf else d_ff
    d_ffp = _round_up(d_ff, tf_eff)

    xp = _pad_rows(x2d, Mp)
    a = jnp.asarray(alpha, jnp.float32).reshape(1, 1)
    bsc = jnp.asarray(bias, jnp.float32).reshape(1, 1)
    w1p = jnp.pad(w1, ((0, 0), (0, d_ffp - d_ff)))
    b1p = jnp.pad(b1.reshape(1, d_ff), ((0, 0), (0, d_ffp - d_ff)))
    w2p = jnp.pad(w2, ((0, d_ffp - d_ff), (0, 0)))
    b2r = b2.reshape(1, D)

    n_m, n_f = Mp // tm_eff, d_ffp // tf_eff
    itemsize = jnp.dtype(x2d.dtype).itemsize
    cost = pl.CostEstimate(
        flops=int(4 * Mp * D * d_ffp + 6 * Mp * D),
        transcendentals=int(Mp),
        bytes_accessed=int((Mp * D + n_m * (D * d_ffp + d_ffp + d_ffp * D)
                            + D + Mp * D) * itemsize))

    out = pl.pallas_call(
        functools.partial(_norm_ffn_kernel, eps=eps, n=D),
        out_shape=jax.ShapeDtypeStruct((Mp, D), x2d.dtype),
        grid_spec=pltpu.PrefetchScalarGridSpec(
            num_scalar_prefetch=0,
            grid=(n_m, n_f),                                            # reduction axis last
            in_specs=[
                pl.BlockSpec((tm_eff, D), lambda i, j: (i, 0)),         # x tile (norm + residual)
                pl.BlockSpec((1, 1), lambda i, j: (0, 0)),              # alpha2
                pl.BlockSpec((1, 1), lambda i, j: (0, 0)),              # bias2
                pl.BlockSpec((D, tf_eff), lambda i, j: (0, j)),         # W1 chunk
                pl.BlockSpec((1, tf_eff), lambda i, j: (0, j)),         # b1 chunk
                pl.BlockSpec((tf_eff, D), lambda i, j: (j, 0)),         # W2 chunk
                pl.BlockSpec((1, D), lambda i, j: (0, 0)),              # b2
            ],
            out_specs=pl.BlockSpec((tm_eff, D), lambda i, j: (i, 0)),
            scratch_shapes=[
                pltpu.VMEM((tm_eff, D), w1.dtype),        # normalized tile (reused across j)
                pltpu.VMEM((tm_eff, D), jnp.float32),     # f32 accumulator
            ],
        ),
        compiler_params=pltpu.CompilerParams(
            dimension_semantics=("parallel", "arbitrary"),
            vmem_limit_bytes=_CHIP_CFG["vmem_limit"]),
        cost_estimate=cost,
    )(xp, a, bsc, w1p, b1p, w2p, b2r)
    return out[:M]


# ----------------------------------------------------------------------------
# EncoderBlock forward (eval mode)
# ----------------------------------------------------------------------------
def encoder_block_forward(x, source_mask, params, *, heads, eps=1e-6,
                          tm=None, tf=None, kv_tile=256):
    tm = _CHIP_CFG["tm"] if tm is None else tm
    tf = _CHIP_CFG["tf"] if tf is None else tf
    B, S, D = x.shape
    assert D % heads == 0, "d_model is not divisible by heads"
    dk = D // heads
    M = B * S
    x2d = x.reshape(M, D)

    # --- residual connection 0: x + W_O(SelfAttention(Norm1(x), mask)) ---
    # Fused QKV weight (in a real model, fuse once at init instead of per forward).
    wqkv = jnp.concatenate([params["wq"], params["wk"], params["wv"]], axis=1)
    bqkv = jnp.concatenate([params["bq"], params["bk"], params["bv"]])
    q2d, k2d, v2d = norm_qkv_projection(x2d, params["alpha1"], params["bias1"],
                                        wqkv, bqkv, eps=eps, tm=tm)

    def heads_view(t):          # (M, D) -> (B, S, H, dk): pure reshape, no transpose
        return t.reshape(B, S, heads, dk)

    attn = multi_head_attention(heads_view(q2d), heads_view(k2d), heads_view(v2d),
                                source_mask, scale=1.0 / math.sqrt(dk), kv_tile=kv_tile)
    # TODO(synk): residual dropout (identity in eval mode).
    x2d = linear_residual(attn.reshape(M, D), params["wo"], params["bo"], x2d, tm=tm)

    # --- residual connection 1: x + FFN(Norm2(x)); norm + residual fused in the kernel ---
    out2d = norm_ffn(x2d, params["alpha2"], params["bias2"],
                     params["w1"], params["b1"], params["w2"], params["b2"],
                     eps=eps, tm=tm, tf=tf)
    return out2d.reshape(B, S, D)


# ----------------------------------------------------------------------------
# pure-JAX reference, init, demo
# ----------------------------------------------------------------------------
def _ref_norm(x, alpha, bias, eps=1e-6):
    mean = jnp.mean(x, axis=-1, keepdims=True)
    std = jnp.std(x, axis=-1, keepdims=True, ddof=1)   # torch.std -> unbiased
    return alpha * (x - mean) / (std + eps) + bias


def encoder_block_ref(x, mask, p, *, heads, eps=1e-6):
    B, S, D = x.shape
    dk = D // heads
    h = _ref_norm(x, p["alpha1"], p["bias1"], eps)
    q = h @ p["wq"] + p["bq"]
    k = h @ p["wk"] + p["bk"]
    v = h @ p["wv"] + p["bv"]

    def split(t):
        return t.reshape(B, S, heads, dk).transpose(0, 2, 1, 3)

    qh, kh, vh = split(q), split(k), split(v)
    s = jnp.einsum("bhqd,bhkd->bhqk", qh, kh) / math.sqrt(dk)
    s = jnp.where(mask == 0, _NEG_INF, s)
    a = jax.nn.softmax(s, axis=-1)
    o = jnp.einsum("bhqk,bhkd->bhqd", a, vh).transpose(0, 2, 1, 3).reshape(B, S, D)
    x = x + (o @ p["wo"] + p["bo"])
    h2 = _ref_norm(x, p["alpha2"], p["bias2"], eps)
    ffn = jnp.maximum(h2 @ p["w1"] + p["b1"], 0.0) @ p["w2"] + p["b2"]
    return x + ffn


def init_params(key, d_model, d_ff, dtype=jnp.float32):
    """nn.Linear-style U(-1/sqrt(fan_in), 1/sqrt(fan_in)); weights stored (in, out)."""
    ks = jax.random.split(key, 12)

    def lin(kw, kb, fan_in, fan_out):
        bound = 1.0 / math.sqrt(fan_in)
        w = jax.random.uniform(kw, (fan_in, fan_out), dtype, -bound, bound)
        b = jax.random.uniform(kb, (fan_out,), dtype, -bound, bound)
        return w, b

    wq, bq = lin(ks[0], ks[1], d_model, d_model)
    wk, bk = lin(ks[2], ks[3], d_model, d_model)
    wv, bv = lin(ks[4], ks[5], d_model, d_model)
    wo, bo = lin(ks[6], ks[7], d_model, d_model)
    w1, b1 = lin(ks[8], ks[9], d_model, d_ff)
    w2, b2 = lin(ks[10], ks[11], d_ff, d_model)
    ones = jnp.ones((), jnp.float32)   # NormalizationLayer: Alpha = Bias = ones(1)
    return dict(wq=wq, bq=bq, wk=wk, bk=bk, wv=wv, bv=bv, wo=wo, bo=bo,
                w1=w1, b1=b1, w2=w2, b2=b2,
                alpha1=ones, bias1=ones, alpha2=ones, bias2=ones)


def _cast_params(params, dtype):
    out = {}
    for name, val in params.items():
        if name.startswith(("alpha", "bias")):
            out[name] = val            # keep norm scalars in f32
        else:
            out[name] = val.astype(dtype)
    return out


if __name__ == "__main__":
    key = jax.random.PRNGKey(0)
    B, S, d_model, d_ff, heads = 2, 8, 128, 256, 4   # lane-dense feature dims

    kx, kp = jax.random.split(key)
    x = jax.random.normal(kx, (B, S, d_model), jnp.float32)
    params = init_params(kp, d_model, d_ff)

    # padding-style source mask: batch 1 cannot attend to its last 2 positions
    mask = jnp.ones((B, 1, S, S), jnp.float32).at[1, :, :, S - 2:].set(0.0)

    ref = encoder_block_ref(x, mask, params, heads=heads)

    # f32 path
    out = encoder_block_forward(x, mask, params, heads=heads)
    out = jax.block_until_ready(out)
    assert out.shape == (B, S, d_model)
    err = float(jnp.max(jnp.abs(out - ref)))
    assert jnp.allclose(out, ref, atol=2e-3, rtol=2e-3), f"f32 mismatch, max abs err {err}"

    # bf16 path (recommended storage dtype on v6e/v7x; f32 MXU accumulation in-kernel)
    out_bf16 = encoder_block_forward(x.astype(jnp.bfloat16), mask,
                                     _cast_params(params, jnp.bfloat16), heads=heads)
    out_bf16 = jax.block_until_ready(out_bf16).astype(jnp.float32)
    assert out_bf16.shape == (B, S, d_model)
    assert bool(jnp.all(jnp.isfinite(out_bf16)))
    assert jnp.allclose(out_bf16, ref, atol=0.25, rtol=0.25), "bf16 mismatch"

    print("KERNEL_OK")
</pallas_src>

<mosaic_0001>
module attributes {stable_mosaic.version = 11 : i64} {
  func.func @_norm_qkv_kernel(%arg0: i32, %arg1: memref<16x128xf32, #tpu.memory_space<vmem>>, %arg2: memref<1x1xf32, #tpu.memory_space<vmem>>, %arg3: memref<1x1xf32, #tpu.memory_space<vmem>>, %arg4: memref<128x384xf32, #tpu.memory_space<vmem>>, %arg5: memref<1x384xf32, #tpu.memory_space<vmem>>, %arg6: memref<16x128xf32, #tpu.memory_space<vmem>>, %arg7: memref<16x128xf32, #tpu.memory_space<vmem>>, %arg8: memref<16x128xf32, #tpu.memory_space<vmem>>) attributes {dimension_semantics = [#tpu.dimension_semantics<parallel>], iteration_bounds = array<i64: 1>, scalar_prefetch = 0 : i64, scratch_operands = 0 : i64, tpu.core_type = #tpu.core_type<tc>, window_params = [{transform_indices = @transform_0, window_bounds = array<i64: 16, 128>}, {pipeline_mode = #tpu.pipeline_mode<synchronous>, transform_indices = @transform_1, window_bounds = array<i64: 1, 1>}, {pipeline_mode = #tpu.pipeline_mode<synchronous>, transform_indices = @transform_2, window_bounds = array<i64: 1, 1>}, {pipeline_mode = #tpu.pipeline_mode<synchronous>, transform_indices = @transform_3, window_bounds = array<i64: 128, 384>}, {pipeline_mode = #tpu.pipeline_mode<synchronous>, transform_indices = @transform_4, window_bounds = array<i64: 1, 384>}, {transform_indices = @transform_5, window_bounds = array<i64: 16, 128>}, {transform_indices = @transform_6, window_bounds = array<i64: 16, 128>}, {transform_indices = @transform_7, window_bounds = array<i64: 16, 128>}]} {
    %c0 = arith.constant 0 : index
    %c0_0 = arith.constant 0 : index
    %0 = vector.load %arg1[%c0, %c0_0] : memref<16x128xf32, #tpu.memory_space<vmem>>, vector<16x128xf32>
    %cst = arith.constant dense<0.000000e+00> : vector<16xf32>
    %1 = vector.multi_reduction <add>, %0, %cst [1] : vector<16x128xf32> to vector<16xf32>
    %2 = vector.shape_cast %1 : vector<16xf32> to vector<16x1xf32>
    %cst_1 = arith.constant 1.280000e+02 : f32
    %3 = vector.broadcast %cst_1 : f32 to vector<16x1xf32>
    %4 = arith.divf %2, %3 : vector<16x1xf32>
    %5 = vector.broadcast %4 : vector<16x1xf32> to vector<16x128xf32>
    %6 = arith.subf %0, %5 : vector<16x128xf32>
    %7 = arith.mulf %6, %6 : vector<16x128xf32>
    %cst_2 = arith.constant dense<0.000000e+00> : vector<16xf32>
    %8 = vector.multi_reduction <add>, %7, %cst_2 [1] : vector<16x128xf32> to vector<16xf32>
    %9 = vector.shape_cast %8 : vector<16xf32> to vector<16x1xf32>
    %cst_3 = arith.constant 0.00787401571 : f32
    %10 = vector.broadcast %cst_3 : f32 to vector<16x1xf32>
    %11 = arith.mulf %9, %10 : vector<16x1xf32>
    %c0_4 = arith.constant 0 : index
    %c0_5 = arith.constant 0 : index
    %12 = vector.load %arg2[%c0_4, %c0_5] : memref<1x1xf32, #tpu.memory_space<vmem>>, vector<1x1xf32>
    %13 = vector.broadcast %4 : vector<16x1xf32> to vector<16x128xf32>
    %14 = arith.subf %0, %13 : vector<16x128xf32>
    %15 = vector.broadcast %12 : vector<1x1xf32> to vector<16x128xf32>
    %16 = arith.mulf %15, %14 : vector<16x128xf32>
    %17 = math.sqrt %11 : vector<16x1xf32>
    %cst_6 = arith.constant 9.99999997E-7 : f32
    %18 = vector.broadcast %cst_6 : f32 to vector<16x1xf32>
    %19 = arith.addf %17, %18 : vector<16x1xf32>
    %20 = vector.broadcast %19 : vector<16x1xf32> to vector<16x128xf32>
    %21 = arith.divf %16, %20 : vector<16x128xf32>
    %c0_7 = arith.constant 0 : index
    %c0_8 = arith.constant 0 : index
    %22 = vector.load %arg3[%c0_7, %c0_8] : memref<1x1xf32, #tpu.memory_space<vmem>>, vector<1x1xf32>
    %23 = vector.broadcast %22 : vector<1x1xf32> to vector<16x128xf32>
    %24 = arith.addf %21, %23 : vector<16x128xf32>
    %c0_9 = arith.constant 0 : index
    %c0_10 = arith.constant 0 : index
    %25 = vector.load %arg4[%c0_9, %c0_10] : memref<128x384xf32, #tpu.memory_space<vmem>>, vector<128x384xf32>
    %cst_11 = arith.constant dense<0.000000e+00> : vector<16x384xf32>
    %26 = tpu.matmul %24, %25, %cst_11 {dimension_numbers = #tpu.dot_dimension_numbers<[1], [0], [0], [1], [0, 0, 1, 1], [], []>} : vector<16x128xf32>, vector<128x384xf32>, vector<16x384xf32> -> vector<16x384xf32>
    %c0_12 = arith.constant 0 : index
    %c0_13 = arith.constant 0 : index
    %27 = vector.load %arg5[%c0_12, %c0_13] : memref<1x384xf32, #tpu.memory_space<vmem>>, vector<1x384xf32>
    %28 = vector.broadcast %27 : vector<1x384xf32> to vector<16x384xf32>
    %29 = arith.addf %26, %28 : vector<16x384xf32>
    %30 = vector.extract_strided_slice %29 {offsets = [0, 0], sizes = [16, 128], strides = [1, 1]} : vector<16x384xf32> to vector<16x128xf32>
    %c0_14 = arith.constant 0 : index
    %c0_15 = arith.constant 0 : index
    %31 = vector.load %arg6[%c0_14, %c0_15] : memref<16x128xf32, #tpu.memory_space<vmem>>, vector<16x128xf32>
    tpu.vector_store %arg6[%c0_14, %c0_15], %30 {strides = array<i32>} : memref<16x128xf32, #tpu.memory_space<vmem>>, vector<16x128xf32>,
    %32 = vector.extract_strided_slice %29 {offsets = [0, 128], sizes = [16, 128], strides = [1, 1]} : vector<16x384xf32> to vector<16x128xf32>
    %c0_16 = arith.constant 0 : index
    %c0_17 = arith.constant 0 : index
    %33 = vector.load %arg7[%c0_16, %c0_17] : memref<16x128xf32, #tpu.memory_space<vmem>>, vector<16x128xf32>
    tpu.vector_store %arg7[%c0_16, %c0_17], %32 {strides = array<i32>} : memref<16x128xf32, #tpu.memory_space<vmem>>, vector<16x128xf32>,
    %34 = vector.extract_strided_slice %29 {offsets = [0, 256], sizes = [16, 128], strides = [1, 1]} : vector<16x384xf32> to vector<16x128xf32>
    %c0_18 = arith.constant 0 : index
    %c0_19 = arith.constant 0 : index
    %35 = vector.load %arg8[%c0_18, %c0_19] : memref<16x128xf32, #tpu.memory_space<vmem>>, vector<16x128xf32>
    tpu.vector_store %arg8[%c0_18, %c0_19], %34 {strides = array<i32>} : memref<16x128xf32, #tpu.memory_space<vmem>>, vector<16x128xf32>,
    return
  }
  func.func @transform_0(%arg0: i32) -> (i32, i32) {
    %c0_i32 = arith.constant 0 : i32
    %c0_i32_0 = arith.constant 0 : i32
    return %arg0, %c0_i32 : i32, i32
  }
  func.func @transform_1(%arg0: i32) -> (i32, i32) {
    %c0_i32 = arith.constant 0 : i32
    %c0_i32_0 = arith.constant 0 : i32
    %c0_i32_1 = arith.constant 0 : i32
    return %c0_i32, %c0_i32_0 : i32, i32
  }
  func.func @transform_2(%arg0: i32) -> (i32, i32) {
    %c0_i32 = arith.constant 0 : i32
    %c0_i32_0 = arith.constant 0 : i32
    %c0_i32_1 = arith.constant 0 : i32
    return %c0_i32, %c0_i32_0 : i32, i32
  }
  func.func @transform_3(%arg0: i32) -> (i32, i32) {
    %c0_i32 = arith.constant 0 : i32
    %c0_i32_0 = arith.constant 0 : i32
    %c0_i32_1 = arith.constant 0 : i32
    return %c0_i32, %c0_i32_0 : i32, i32
  }
  func.func @transform_4(%arg0: i32) -> (i32, i32) {
    %c0_i32 = arith.constant 0 : i32
    %c0_i32_0 = arith.constant 0 : i32
    %c0_i32_1 = arith.constant 0 : i32
    return %c0_i32, %c0_i32_0 : i32, i32
  }
  func.func @transform_5(%arg0: i32) -> (i32, i32) {
    %c0_i32 = arith.constant 0 : i32
    %c0_i32_0 = arith.constant 0 : i32
    return %arg0, %c0_i32 : i32, i32
  }
  func.func @transform_6(%arg0: i32) -> (i32, i32) {
    %c0_i32 = arith.constant 0 : i32
    %c0_i32_0 = arith.constant 0 : i32
    return %arg0, %c0_i32 : i32, i32
  }
  func.func @transform_7(%arg0: i32) -> (i32, i32) {
    %c0_i32 = arith.constant 0 : i32
    %c0_i32_0 = arith.constant 0 : i32
    return %arg0, %c0_i32 : i32, i32
  }
}

</mosaic_0001>

<bundles_post_ra>
// kernel: tpu_custom_call.1
= control target key start
LH: loop header
LB: loop body
LE: loop exit
PB: predicated region body
PF: predicated region fallthrough
CT: control target
= control target key end

     0   :  { %s806_s0 = inlined_call_operand.hbm [shape: f32[16,128], index: 0, kind: input, shape index: {}]   ;;  %s807_s1 = inlined_call_operand.<no memory space> [shape: f32[1,1], index: 1, kind: input, shape index: {}]   ;;  %s808_s3 = inlined_call_operand.hbm [shape: f32[128,384], index: 3, kind: input, shape index: {}]   ;;  %s809_s4 = inlined_call_operand.vmem [shape: f32[1,384], index: 4, kind: input, shape index: {}]   ;;  %s810_s5 = inlined_call_operand.hbm [shape: f32[16,128], index: 5, kind: output, shape index: {0}]   ;;  %s811_s6 = inlined_call_operand.hbm [shape: f32[16,128], index: 6, kind: output, shape index: {1}]   ;;  %s812_s7 = inlined_call_operand.hbm [shape: f32[16,128], index: 7, kind: output, shape index: {2}]   ;;  %s813_s2 = inlined_call_operand.<no memory space> [shape: f32[1,1], index: 2, kind: input, shape index: {}]  }
   0x1   :  { %v13_v0 = vstv %s807_s1  ;;  %v15_v1 = vstv %s813_s2 }
   0x2   :  { %14 = vst [vmem:[#allocation2] sm:$0x1] %v13_v0  ;;  %16 = vst [vmem:[#allocation3] sm:$0x1] %v15_v1 }
   0x3   :  { %17 = vsyncpa [#allocation5], 0 }
   0x4   :  { %18 = vsyncpa [#allocation8], 0 }
   0x5   :  { %19 = vsyncpa [#allocation6], 0 }
   0x6   :  { %20 = vsyncpa [#allocation11], 0  ;;  %s650_s28 = smov [#allocation4]   ;;  %s532_s9 = scalar_lea.hbm %s806_s0, 256 }
   0x7   :  { %s26_s29 = sshll.u32 %s650_s28, 4  ;;  %p533_p0 = scmp.ne.s32.totalorder %s806_s0, %s532_s9  ;;  %s27_s29 = int_to_ptr.vmem [resolvable:$true] %s26_s29 }
   0x8   :  { %p536_p1 = scmp.lt.u32.totalorder %s532_s9, %s806_s0 }
   0xa   :  { %p538_p2 = pnand %p536_p1, %p533_p0 }
   0xc   :  { %541 = shalt.err (!%p538_p2)
}
   0xd   :  { %s542_s2 = scalar_lea.vmem %s27_s29, 256  ;;  %p547_p4 = scmp.lt.s32.totalorder %s27_s29, %s27_s29 }
   0xe   :  { %p543_p3 = scmp.ne.s32.totalorder %s27_s29, %s542_s2  ;;  %p548_p5 = scmp.lt.s32.totalorder %s542_s2, %s542_s2 }
  0x10   :  { %p549_p6 = por %p548_p5, %p547_p4 }
  0x12   :  { %p550_p7 = pnand %p549_p6, %p543_p3 }
  0x14   :  { %553 = shalt.err (!%p550_p7)
}
  0x15   :  { %s651_s13 = smov 128   ;;  %s652_s14 = smov 8  }
  0x16   :  { %32 = dma.hbm_to_vmem [thread:$0]  %s806_s0, 256, %s27_s29, [#allocation5], %s651_s13, %s651_s13, %s652_s14  }
  0x17   :  { %s653_s17 = smov [#allocation7]   ;;  %s554_s21 = scalar_lea.hbm %s808_s3, 6144 }
  0x18   :  { %s42_s18 = sshll.u32 %s653_s17, 4  ;;  %p555_p8 = scmp.ne.s32.totalorder %s808_s3, %s554_s21  ;;  %s43_s18 = int_to_ptr.vmem [resolvable:$true] %s42_s18 }
  0x19   :  { %p558_p9 = scmp.lt.u32.totalorder %s554_s21, %s808_s3 }
  0x1b   :  { %p560_p10 = pnand %p558_p9, %p555_p8 }
  0x1d   :  { %563 = shalt.err (!%p560_p10)
}
  0x1e   :  { %s564_s26 = scalar_lea.vmem %s43_s18, 6144  ;;  %p569_p12 = scmp.lt.s32.totalorder %s43_s18, %s43_s18 }
  0x1f   :  { %p565_p11 = scmp.ne.s32.totalorder %s43_s18, %s564_s26  ;;  %p570_p13 = scmp.lt.s32.totalorder %s564_s26, %s564_s26 }
  0x21   :  { %p571_p0 = por %p570_p13, %p569_p12 }
  0x23   :  { %p572_p1 = pnand %p571_p0, %p565_p11 }
  0x25   :  { %575 = shalt.err (!%p572_p1)
}
  0x26   :  { %s654_s0 = smov 384   ;;  %s655_s27 = smov 24  }
  0x27   :  { %48 = dma.hbm_to_vmem [thread:$0]  %s808_s3, 6144, %s43_s18, [#allocation8], %s654_s0, %s654_s0, %s655_s27  }
  0x28   :  { %642 = dma.done.wait [#allocation5], 256  }
  0x29   :  { %643 = vsyncadd [#allocation5], 4294967040 }
  0x2a   :  { %644 = dma.done.wait [#allocation8], 6144  }
  0x2b   :  { %645 = vsyncadd [#allocation8], 4294961152  ;;  %v656_v2 = vmov 0   ;;  %v57_v3 = vld [vmem:[#allocation4] sm:$0xff]  ;;  %v58_v4 = vld [vmem:[#allocation4 + $0x8] sm:$0xff]  ;;  %s658_s8 = smov [#allocation9]  }
  0x2c   :  { %522 = vset.pattern.permute.xlu0 %v656_v2  ;;  %523 = vset.pattern.permute.xlu1 %v656_v2  ;;  %v392_v5 = vld [vmem:[#allocation2] ss:$0 sm:$0xff]  ;;  %v124_v15 = vld [vmem:[#allocation7 + $0x20] sm:$0xff]  ;;  %v123_v18 = vld [vmem:[#allocation7 + $0x18] sm:$0xff]  ;;  %s348_s9 = sshll.u32 %s658_s8, 4  ;;  %s659_s10 = smov [#allocation10]   ;;  %s349_s9 = int_to_ptr.vmem [resolvable:$true] %s348_s9 }
  0x2d   :  { %59 = vadd.xlane.f32.xlu0 %v57_v3  ;;  %v121_v14 = vld [vmem:[#allocation7 + $0x8] sm:$0xff]  ;;  %v120_v17 = vld [vmem:[#allocation7] sm:$0xff]  ;;  %v127_v21 = vld [vmem:[#allocation7 + $0x38] sm:$0xff]  ;;  %s360_s11 = sshll.u32 %s659_s10, 4  ;;  %s660_s1 = smov [#allocation12]   ;;  %s747_s11 = int_to_ptr.vmem [resolvable:$true] %s360_s11 }
  0x2e   :  { %v447_v16 = vpack.c.bf16 %v124_v15, %v121_v14  ;;  %v449_v19 = vpack.c.bf16 %v123_v18, %v120_v17  ;;  %v393_v20 = vld [vmem:[#allocation3] ss:$0 sm:$0xff]  ;;  %v130_v22 = vld [vmem:[#allocation7 + $0x50] sm:$0xff]  ;;  %v136_v31 = vld [vmem:[#allocation7 + $0x80] sm:$0xff]  ;;  %s372_s12 = sshll.u32 %s660_s1, 4  ;;  %p581_p3 = scmp.lt.s32.totalorder %s349_s9, %s349_s9  ;;  %s749_s12 = int_to_ptr.vmem [resolvable:$true] %s372_s12 }
  0x2f   :  { %v122_v23 = vld [vmem:[#allocation7 + $0x10] sm:$0xff]  ;;  %v451_v24 = vpack.c.bf16 %v130_v22, %v127_v21  ;;  %v125_v25 = vld [vmem:[#allocation7 + $0x28] sm:$0xff]  ;;  %v128_v32 = vld [vmem:[#allocation7 + $0x40] sm:$0xff] }
  0x30   :  { %448 = vmatprep.subr.bf16.mxu0 %v447_v16  ;;  %v126_v26 = vld [vmem:[#allocation7 + $0x30] sm:$0xff]  ;;  %v129_v27 = vld [vmem:[#allocation7 + $0x48] sm:$0xff]  ;;  %v479_v28 = vpack.c.bf16 %v125_v25, %v122_v23  ;;  %v131_v34 = vld [vmem:[#allocation7 + $0x58] sm:$0xff]  ;;  %v657_v25 = vmov 0.0  }
  0x31   :  { %61 = vadd.xlane.f32.xlu0 %v58_v4  ;;  %450 = vmatpush1.bf16.msra.mxu0 %v449_v19  ;;  %v453_v29 = vpack.c.bf16 %v129_v27, %v126_v26  ;;  %v133_v30 = vld [vmem:[#allocation7 + $0x68] sm:$0xff]  ;;  %v132_v35 = vld [vmem:[#allocation7 + $0x60] sm:$0xff]  ;;  %v135_v36 = vld [vmem:[#allocation7 + $0x78] sm:$0xff]  ;;  %v483_v37 = vpack.c.bf16 %v131_v34, %v128_v32 }
  0x32   :  { %452 = vmatprep.subr.bf16.mxu0 %v451_v24  ;;  %480 = vmatprep.subr.bf16.mxu1 %v479_v28  ;;  %v455_v33 = vpack.c.bf16 %v136_v31, %v133_v30  ;;  %v457_v38 = vpack.c.bf16 %v135_v36, %v132_v35  ;;  %v139_v39 = vld [vmem:[#allocation7 + $0x98] sm:$0xff]  ;;  %v142_v40 = vld [vmem:[#allocation7 + $0xb0] sm:$0xff]  ;;  %v137_v43 = vld [vmem:[#allocation7 + $0x88] sm:$0xff] }
  0x33   :  { %482 = vmatpush3.bf16.msra.mxu1 %v479_v28  ;;  %v134_v41 = vld [vmem:[#allocation7 + $0x70] sm:$0xff]  ;;  %v459_v42 = vpack.c.bf16 %v142_v40, %v139_v39  ;;  %v141_v45 = vld [vmem:[#allocation7 + $0xa8] sm:$0xff]  ;;  %v148_v49 = vld [vmem:[#allocation7 + $0xe0] sm:$0xff]  ;;  %249 = vmatprep.mubr.f32.mxu0 %v657_v25 }
  0x34   :  { %484 = vmatprep.subr.bf16.mxu1 %v483_v37  ;;  %v138_v44 = vld [vmem:[#allocation7 + $0x90] sm:$0xff]  ;;  %v487_v46 = vpack.c.bf16 %v137_v43, %v134_v41  ;;  %v145_v48 = vld [vmem:[#allocation7 + $0xc8] sm:$0xff]  ;;  %v140_v50 = vld [vmem:[#allocation7 + $0xa0] sm:$0xff] }
  0x35   :  { %454 = vmatpush1.bf16.msra.mxu0 %v453_v29  ;;  %v461_v47 = vpack.c.bf16 %v141_v45, %v138_v44  ;;  %v463_v51 = vpack.c.bf16 %v148_v49, %v145_v48  ;;  %v143_v52 = vld [vmem:[#allocation7 + $0xb8] sm:$0xff]  ;;  %v144_v53 = vld [vmem:[#allocation7 + $0xc0] sm:$0xff]  ;;  %v154_v58 = vld [vmem:[#allocation7 + $0x110] sm:$0xff] }
  0x36   :  { %456 = vmatprep.subr.bf16.mxu0 %v455_v33  ;;  %v147_v54 = vld [vmem:[#allocation7 + $0xd8] sm:$0xff]  ;;  %v491_v55 = vpack.c.bf16 %v143_v52, %v140_v50  ;;  %v146_v59 = vld [vmem:[#allocation7 + $0xd0] sm:$0xff]  ;;  %v149_v61 = vld [vmem:[#allocation7 + $0xe8] sm:$0xff]  ;;  %v170_v52 = vlaneseq }
  0x37   :  { %486 = vmatpush3.bf16.msra.mxu1 %v483_v37  ;;  %v465_v56 = vpack.c.bf16 %v147_v54, %v144_v53  ;;  %v151_v57 = vld [vmem:[#allocation7 + $0xf8] sm:$0xff]  ;;  %v150_v62 = vld [vmem:[#allocation7 + $0xf0] sm:$0xff]  ;;  %v153_v63 = vld [vmem:[#allocation7 + $0x108] sm:$0xff]  ;;  %v495_v0 = vpack.c.bf16 %v149_v61, %v146_v59 }
  0x38   :  { %488 = vmatprep.subr.bf16.mxu1 %v487_v46  ;;  %v467_v60 = vpack.c.bf16 %v154_v58, %v151_v57  ;;  %v157_v1 = vld [vmem:[#allocation7 + $0x128] sm:$0xff]  ;;  %v160_v2 = vld [vmem:[#allocation7 + $0x140] sm:$0xff]  ;;  %v158_v14 = vld [vmem:[#allocation7 + $0x130] sm:$0xff]  ;;  %v171_v53 = vshrl.u32 %v170_v52, 7 }
  0x39   :  { %458 = vmatpush1.bf16.msra.mxu0 %v457_v38  ;;  %v161_v15 = vld [vmem:[#allocation7 + $0x148] sm:$0xff]  ;;  %v162_v19 = vld [vmem:[#allocation7 + $0x150] sm:$0xff]  ;;  %v164_v22 = vld [vmem:[#allocation7 + $0x160] sm:$0xff] }
  0x3a   :  { %460 = vmatprep.subr.bf16.mxu0 %v459_v42  ;;  %v503_v18 = vpack.c.bf16 %v161_v15, %v158_v14  ;;  %v167_v23 = vld [vmem:[#allocation7 + $0x178] sm:$0xff]  ;;  %v172_v54 = vsub.s32 0, %v171_v53  ;;  %v180_v57 = vsub.s32 2, %v171_v53 }
  0x3b   :  { %490 = vmatpush3.bf16.msra.mxu1 %v487_v46  ;;  %v507_v24 = vpack.c.bf16 %v167_v23, %v164_v22 }
  0x3c   :  { %492 = vmatprep.subr.bf16.mxu1 %v491_v55 }
  0x3d   :  { %462 = vmatpush1.bf16.msra.mxu0 %v461_v47 }
  0x3e   :  { %464 = vmatprep.subr.bf16.mxu0 %v463_v51 }
  0x3f   :  { %494 = vmatpush3.bf16.msra.mxu1 %v491_v55  ;;  %v176_v55 = vsub.s32 1, %v171_v53 }
  0x40   :  { %496 = vmatprep.subr.bf16.mxu1 %v495_v0 }
  0x41   :  { %466 = vmatpush1.bf16.msra.mxu0 %v465_v56 }
  0x42   :  { %468 = vmatprep.subr.bf16.mxu0 %v467_v60 }
  0x43   :  { %498 = vmatpush3.bf16.msra.mxu1 %v495_v0 }
  0x47   :  { %83 = vperm.xlu0 %522, %v392_v5   ;;  %v155_v5 = vld [vmem:[#allocation7 + $0x118] sm:$0xff] }
  0xba   :  { %v60_v6 = vpop.xlane.xlu0 %59 }
  0xbb   :  { %v64_v7 = vmul.f32 0.0078125, %v60_v6  ;;  %v471_v6 = vpack.c.bf16 %v160_v2, %v157_v1 }
  0xbd   :  { %v734_v8 = vsub.f32 %v57_v3, %v64_v7  ;;  %v152_v3 = vld [vmem:[#allocation7 + $0x100] sm:$0xff] }
  0xbe   :  { %v62_v9 = vpop.xlane.xlu0 %61  ;;  %v499_v7 = vpack.c.bf16 %v155_v5, %v152_v3 }
  0xbf   :  { %v65_v10 = vmul.f32 0.0078125, %v62_v9  ;;  %v68_v11 = vmul.f32 %v734_v8, %v734_v8  ;;  %v156_v9 = vld [vmem:[#allocation7 + $0x120] sm:$0xff] }
  0xc0   :  { %500 = vmatprep.subr.bf16.mxu1 %v499_v7 }
  0xc1   :  { %v738_v12 = vsub.f32 %v58_v4, %v65_v10  ;;  %70 = vadd.xlane.f32.xlu1 %v68_v11  ;;  %v469_v4 = vpack.c.bf16 %v153_v63, %v150_v62  ;;  %v159_v10 = vld [vmem:[#allocation7 + $0x138] sm:$0xff]  ;;  %502 = vmatpush3.bf16.msra.mxu1 %v499_v7 }
  0xc2   :  { %v163_v11 = vld [vmem:[#allocation7 + $0x158] sm:$0xff]  ;;  %v473_v16 = vpack.c.bf16 %v159_v10, %v156_v9  ;;  %504 = vmatprep.subr.bf16.mxu1 %v503_v18 }
  0xc3   :  { %v69_v13 = vmul.f32 %v738_v12, %v738_v12  ;;  %470 = vmatpush1.bf16.msra.mxu0 %v469_v4 }
  0xc4   :  { %472 = vmatprep.subr.bf16.mxu0 %v471_v6 }
  0xc5   :  { %72 = vadd.xlane.f32.xlu1 %v69_v13  ;;  %v166_v13 = vld [vmem:[#allocation7 + $0x170] sm:$0xff]  ;;  %506 = vmatpush3.bf16.msra.mxu1 %v503_v18 }
  0xc6   :  { %v475_v17 = vpack.c.bf16 %v166_v13, %v163_v11  ;;  %508 = vmatprep.subr.bf16.mxu1 %v507_v24  ;;  %v84_v42 = vpop.permute.xlu0 %83 }
  0xc7   :  { %474 = vmatpush1.bf16.msra.mxu0 %v473_v16  ;;  %v86_v43 = vmul.f32 %v84_v42, %v734_v8  ;;  %v87_v47 = vmul.f32 %v84_v42, %v738_v12  ;;  %v168_v8 = vld [vmem:[%s809_s4] sm:$0x7]  ;;  %s576_s4 = scalar_lea.vmem %s349_s9, 256 }
  0xc8   :  { %476 = vmatprep.subr.bf16.mxu0 %v475_v17  ;;  %v173_v56 = vrot.slane %v168_v8, %v172_v54  ;;  %v177_v12 = vrot.slane %v168_v8, %v176_v55  ;;  %v181_v61 = vrot.slane %v168_v8, %v180_v57  ;;  %p577_p2 = scmp.ne.s32.totalorder %s349_s9, %s576_s4  ;;  %p582_p4 = scmp.lt.s32.totalorder %s576_s4, %s576_s4 }
  0xc9   :  { %510 = vmatpush3.bf16.msra.mxu1 %v507_v24 }
  0xca   :  { %p583_p5 = por %p582_p4, %p581_p3 }
  0xcc   :  { %p584_p6 = pnand %p583_p5, %p577_p2 }
  0xd6   :  { %115 = vperm.xlu1 %523, %v393_v20   ;;  %v165_v20 = vld [vmem:[#allocation7 + $0x168] sm:$0xff] }
  0xd7   :  { %v477_v21 = vpack.c.bf16 %v165_v20, %v162_v19 }
  0xd9   :  { %478 = vmatpush1.bf16.msra.mxu0 %v477_v21 }
 0x14e   :  { %v71_v26 = vpop.xlane.xlu1 %70 }
 0x14f   :  { %v74_v27 = vmul.f32 0.007874016, %v71_v26 }
 0x151   :  { %524 = vrsqrt.f32 %v74_v27  ;;  %vm90_vm0 = vcmp.eq.f32.partialorder %v74_v27, inf  ;;  %v93_v32 = vand.u32 2147483648, %v74_v27  ;;  %vm92_vm1 = vcmp.eq.f32.partialorder %v74_v27, 0.0 }
 0x152   :  { %v73_v28 = vpop.xlane.xlu1 %72 }
 0x153   :  { %v75_v29 = vmul.f32 0.007874016, %v73_v28 }
 0x155   :  { %526 = vrsqrt.f32 %v75_v29  ;;  %vm97_vm2 = vcmp.eq.f32.partialorder %v75_v29, inf  ;;  %v100_v38 = vand.u32 2147483648, %v75_v29  ;;  %vm99_vm3 = vcmp.eq.f32.partialorder %v75_v29, 0.0 }
 0x156   :  { %v116_v45 = vpop.permute.xlu1 %115 }
 0x15b   :  { %v525_v30 = vpop.eup %524 }
 0x15c   :  { %v89_v31 = vmul.f32 %v525_v30, %v74_v27 }
 0x15e   :  { %v91_v33 = vsel %vm90_vm0, %v74_v27, %v89_v31 }
 0x15f   :  { %v527_v34 = vpop.eup %526  ;;  %v94_v35 = vsel %vm92_vm1, %v93_v32, %v91_v33 }
 0x160   :  { %v96_v36 = vmul.f32 %v527_v34, %v75_v29  ;;  %v102_v37 = vadd.f32 1e-06, %v94_v35 }
 0x162   :  { %v98_v39 = vsel %vm97_vm2, %v75_v29, %v96_v36  ;;  %528 = vrcp.f32 %v102_v37 }
 0x163   :  { %v101_v40 = vsel %vm99_vm3, %v100_v38, %v98_v39 }
 0x164   :  { %v103_v41 = vadd.f32 1e-06, %v101_v40 }
 0x166   :  { %530 = vrcp.f32 %v103_v41 }
 0x16c   :  { %v529_v44 = vpop.eup %528 }
 0x16d   :  { %v105_v46 = vmul.f32 %v529_v44, %v86_v43 }
 0x16f   :  { %v118_v48 = vadd.f32 %v116_v45, %v105_v46 }
 0x170   :  { %v531_v49 = vpop.eup %530 }
 0x171   :  { %v107_v50 = vmul.f32 %v531_v49, %v87_v47  ;;  %250 = vmatmul.mubr.f32.vlgmr.msra.gmra.mrb[0].mxu0 %v118_v48  ;;  %444 = vmatprep.mubr.f32.mxu1 %v118_v48 }
 0x172   :  { %255 = vmatprep.mubr.f32.mxu0 %v657_v25 }
 0x173   :  { %v119_v51 = vadd.f32 %v116_v45, %v107_v50 }
 0x175   :  { %256 = vmatmul.mubr.f32.gmra.mrb[2].mxu0 %v119_v51  ;;  %445 = vmatmul.mubr.f32.vlgmr.msra.gmra.mrb[0].mxu1 %v119_v51 }
 0x244   :  { %v251_v58 = vpop.f32.mrb[0].mxu0 }
 0x245   :  { %v252_v59 = vadd.f32 %v251_v58, %v173_v56  ;;  %v253_v60 = vpop.f32.mrb[1].mxu0 }
 0x246   :  { %v254_v62 = vadd.f32 %v253_v60, %v177_v12 }
 0x247   :  { %337 = vst [vmem:[#allocation9] sm:$0xff] %v252_v59 }
 0x248   :  { %339 = vst [vmem:[#allocation10] sm:$0xff] %v254_v62  ;;  %v257_v63 = vpop.f32.mrb[2].mxu0  ;;  %v446_v0 = vpop.f32.mrb[0].mxu1 }
 0x249   :  { %v258_v1 = vadd.f32 %v257_v63, %v173_v56  ;;  %v334_v2 = vadd.f32 %v446_v0, %v181_v61  ;;  %v259_v3 = vpop.f32.mrb[3].mxu0  ;;  %v328_v4 = vpop.f32.mrb[1].mxu1 }
 0x24a   :  { %v260_v5 = vadd.f32 %v259_v3, %v177_v12  ;;  %v329_v6 = vadd.f32 %v328_v4, %v181_v61 }
 0x24b   :  { %338 = vst [vmem:[#allocation9 + $0x8] sm:$0xff] %v258_v1  ;;  %342 = vst [vmem:[#allocation12 + $0x8] sm:$0xff] %v334_v2 }
 0x24c   :  { %340 = vst [vmem:[#allocation10 + $0x8] sm:$0xff] %v260_v5  ;;  %341 = vst [vmem:[#allocation12] sm:$0xff] %v329_v6 }
 0x24d   :  { %587 = shalt.err (!%p584_p6)
}
 0x24e   :  { %s588_s16 = scalar_lea.hbm %s810_s5, 256 }
 0x24f   :  { %p589_p7 = scmp.ne.s32.totalorder %s810_s5, %s588_s16  ;;  %p592_p8 = scmp.lt.u32.totalorder %s588_s16, %s810_s5 }
 0x251   :  { %p594_p9 = pnand %p592_p8, %p589_p7 }
 0x253   :  { %597 = shalt.err (!%p594_p9)
}
 0x254   :  { %354 = dma.vmem_to_hbm [thread:$0]  %s349_s9, 256, %s810_s5, [#allocation6], %s651_s13, %s651_s13, %s652_s14  }
 0x255   :  { %s598_s23 = scalar_lea.vmem %s747_s11, 256  ;;  %p603_p11 = scmp.lt.s32.totalorder %s747_s11, %s747_s11 }
 0x256   :  { %p599_p10 = scmp.ne.s32.totalorder %s747_s11, %s598_s23  ;;  %p604_p12 = scmp.lt.s32.totalorder %s598_s23, %s598_s23 }
 0x258   :  { %p605_p13 = por %p604_p12, %p603_p11 }
 0x25a   :  { %p606_p0 = pnand %p605_p13, %p599_p10 }
 0x25c   :  { %609 = shalt.err (!%p606_p0)
}
 0x25d   :  { %s610_s26 = scalar_lea.hbm %s811_s6, 256 }
 0x25e   :  { %p611_p1 = scmp.ne.s32.totalorder %s811_s6, %s610_s26  ;;  %p614_p2 = scmp.lt.u32.totalorder %s610_s26, %s811_s6 }
 0x260   :  { %p616_p3 = pnand %p614_p2, %p611_p1 }
 0x262   :  { %619 = shalt.err (!%p616_p3)
}
 0x263   :  { %366 = dma.vmem_to_hbm [thread:$0]  %s747_s11, 256, %s811_s6, [#allocation11], %s651_s13, %s651_s13, %s652_s14  }
 0x264   :  { %s620_s30 = scalar_lea.vmem %s749_s12, 256  ;;  %p625_p5 = scmp.lt.s32.totalorder %s749_s12, %s749_s12 }
 0x265   :  { %p621_p4 = scmp.ne.s32.totalorder %s749_s12, %s620_s30  ;;  %p626_p6 = scmp.lt.s32.totalorder %s620_s30, %s620_s30 }
 0x267   :  { %p627_p7 = por %p626_p6, %p625_p5 }
 0x269   :  { %p628_p8 = pnand %p627_p7, %p621_p4 }
 0x26b   :  { %631 = shalt.err (!%p628_p8)
}
 0x26c   :  { %s632_s10 = scalar_lea.hbm %s812_s7, 256 }
 0x26d   :  { %p633_p9 = scmp.ne.s32.totalorder %s812_s7, %s632_s10  ;;  %p636_p10 = scmp.lt.u32.totalorder %s632_s10, %s812_s7 }
 0x26f   :  { %p638_p11 = pnand %p636_p10, %p633_p9 }
 0x271   :  { %641 = shalt.err (!%p638_p11)
}
 0x272   :  { %378 = dma.vmem_to_hbm [thread:$0]  %s749_s12, 256, %s812_s7, [#allocation11], %s651_s13, %s651_s13, %s652_s14  }
 0x273   :  { %646 = dma.done.wait [#allocation6], 256  }
 0x274   :  { %647 = vsyncadd [#allocation6], 4294967040 }
 0x275   :  { %648 = dma.done.wait [#allocation11], 512  }
 0x276   :  { %649 = vsyncadd [#allocation11], 4294966784 }
 0x277   :  { %388 = vsyncpa [#allocation5], 1 }
 0x278   :  { %389 = vsyncpa [#allocation8], 1 }
 0x279   :  { %390 = vsyncpa [#allocation6], 1 }
 0x27a   :  { %391 = vsyncpa [#allocation11], 1 }

</bundles_post_ra>
